<compile_context>
chip_gen: v7x
topology: tpu7x:2x2x1
jax: 0.10.0
libtpu: 0.0.40
codegen_flags: <defaults>
</compile_context>

<pallas_src>
import functools

import jax
import jax.numpy as jnp
from jax.experimental import pallas as pl
from jax.experimental.pallas import tpu as pltpu


_VMEM_BUDGET = 48 * 1024 * 1024   # double-buffered working-set cap (v7x-safe)
_VMEM_LIMIT = 64 * 1024 * 1024    # scoped-VMEM limit handed to the compiler


# ----------------------------- Pallas kernel --------------------------------
def _fused_matmul_kernel(*refs, multi_k: bool, apply_bias: bool,
                         apply_relu: bool):
    """O = act(A @ B + bias) with f32 accumulation.

    Ref order: a, b, [bias], o, [acc (only when multi_k)]."""
    if multi_k:
        *io_refs, acc_ref = refs
    else:
        io_refs, acc_ref = refs, None
    if apply_bias:
        a_ref, b_ref, bias_ref, o_ref = io_refs
    else:
        a_ref, b_ref, o_ref = io_refs
        bias_ref = None

    if multi_k:
        k = pl.program_id(2)

        @pl.when(k == 0)
        def _():
            acc_ref[...] = jnp.zeros_like(acc_ref)

        acc_ref[...] += jnp.dot(a_ref[...], b_ref[...],
                                preferred_element_type=jnp.float32)

        @pl.when(k == pl.num_programs(2) - 1)
        def _():
            y = acc_ref[...]
            if apply_bias:
                y = y + bias_ref[...]
            if apply_relu:
                y = jnp.maximum(y, 0.0)
            o_ref[...] = y.astype(o_ref.dtype)
    else:
        # Single reduction step: no scratch accumulator, no init/finalize.
        y = jnp.dot(a_ref[...], b_ref[...], preferred_element_type=jnp.float32)
        if apply_bias:
            y = y + bias_ref[...]
        if apply_relu:
            y = jnp.maximum(y, 0.0)
        o_ref[...] = y.astype(o_ref.dtype)


# ----------------------------- tiling helpers --------------------------------
def _round_up(n, m):
    return ((n + m - 1) // m) * m


def _choose_tile(dim, pref):
    """Largest multiple of 128 that divides `dim` and is <= max(pref, 128)."""
    assert dim > 0 and dim % 128 == 0, f"dim {dim} must be a multiple of 128"
    t = max(128, min(pref, dim))
    t -= t % 128
    while dim % t:
        t -= 128
    return t


def _choose_tiles(m, n, k, a_bytes, b_bytes, out_bytes,
                  tm_pref, tn_pref, tk_pref, budget):
    tm = _choose_tile(m, tm_pref)
    tn = _choose_tile(n, tn_pref)
    tk = _choose_tile(k, tk_pref)

    def footprint(tm_, tn_, tk_):
        fp = 2 * tm_ * tk_ * a_bytes          # double-buffered A tiles
        fp += 2 * tk_ * tn_ * b_bytes         # double-buffered B tiles
        fp += 2 * tm_ * tn_ * out_bytes       # double-buffered output tiles
        if k // tk_ > 1:
            fp += tm_ * tn_ * 4               # f32 accumulator scratch
        return fp

    # Shrink tk first (cheapest: more reduction steps), then tm.
    while footprint(tm, tn, tk) > budget and tk > 128:
        tk = _choose_tile(k, tk - 128)
    while footprint(tm, tn, tk) > budget and tm > 128:
        tm = _choose_tile(m, tm - 128)

    # v7x has 2 TensorCores: keep at least 2 tiles on the "parallel" row axis
    # when the problem allows it, so the grid can shard across both cores.
    if m // tm < 2 and m // 128 >= 2:
        tm = _choose_tile(m, m // 2)

    return tm, tn, tk


# --------------------------- fused matmul wrapper -----------------------------
def fused_matmul(a, b, bias=None, *, apply_relu=False, out_dtype=jnp.float32,
                 tm_pref=1024, tn_pref=1024, tk_pref=2048):
    """act(a @ b + bias), tiled over (rows, cols[, reduction]).

    All dims of a/b must already be padded to multiples of 128."""
    m, k = a.shape
    k2, n = b.shape
    assert k == k2

    tm, tn, tk = _choose_tiles(
        m, n, k, a.dtype.itemsize, b.dtype.itemsize,
        jnp.dtype(out_dtype).itemsize, tm_pref, tn_pref, tk_pref, _VMEM_BUDGET)

    k_steps = k // tk
    multi_k = k_steps > 1
    apply_bias = bias is not None

    kernel = functools.partial(_fused_matmul_kernel, multi_k=multi_k,
                               apply_bias=apply_bias, apply_relu=apply_relu)

    inputs = [a, b]
    if multi_k:
        grid = (m // tm, n // tn, k_steps)
        in_specs = [pl.BlockSpec((tm, tk), lambda i, j, kk: (i, kk)),
                    pl.BlockSpec((tk, tn), lambda i, j, kk: (kk, j))]
        if apply_bias:
            in_specs.append(pl.BlockSpec((1, tn), lambda i, j, kk: (0, j)))
        out_spec = pl.BlockSpec((tm, tn), lambda i, j, kk: (i, j))
        scratch = [pltpu.VMEM((tm, tn), jnp.float32)]
        dims = ("parallel", "parallel", "arbitrary")
    else:
        grid = (m // tm, n // tn)
        in_specs = [pl.BlockSpec((tm, tk), lambda i, j: (i, 0)),
                    pl.BlockSpec((tk, tn), lambda i, j: (0, j))]
        if apply_bias:
            in_specs.append(pl.BlockSpec((1, tn), lambda i, j: (0, j)))
        out_spec = pl.BlockSpec((tm, tn), lambda i, j: (i, j))
        scratch = []
        dims = ("parallel", "parallel")

    if apply_bias:
        inputs.append(bias.astype(jnp.float32).reshape(1, n))

    return pl.pallas_call(
        kernel,
        out_shape=jax.ShapeDtypeStruct((m, n), out_dtype),
        grid_spec=pltpu.PrefetchScalarGridSpec(
            num_scalar_prefetch=0,
            grid=grid,
            in_specs=in_specs,
            out_specs=out_spec,
            scratch_shapes=scratch),
        compiler_params=pltpu.CompilerParams(
            dimension_semantics=dims,
            vmem_limit_bytes=_VMEM_LIMIT),
    )(*inputs)


# ------------------------------ GCN layers -----------------------------------
def gcn_conv(a_hat, x, w, b, *, apply_relu, out_dtype):
    """One GCNConv layer: act(A_hat @ X @ W + b).  X@W is hoisted out of the
    A_hat reduction and the association chosen so the N^2 matmul sees
    min(C_in, C_out) output channels."""
    c_in, c_out = w.shape
    if c_out <= c_in:
        xw = fused_matmul(x, w, None, apply_relu=False, out_dtype=jnp.bfloat16)
        return fused_matmul(a_hat, xw, b, apply_relu=apply_relu,
                            out_dtype=out_dtype)
    else:
        ax = fused_matmul(a_hat, x, None, apply_relu=False,
                          out_dtype=jnp.bfloat16)
        return fused_matmul(ax, w, b, apply_relu=apply_relu,
                            out_dtype=out_dtype)


# ------------------------------ Glue (plain JAX) -----------------------------
def build_normalized_adjacency(edge_index, num_nodes):
    """A_hat = D^{-1/2} (A + I) D^{-1/2}, A[target, source] += 1 per edge
    (scatter-add: duplicate edges count, matching PyG's gcn_norm)."""
    src = edge_index[0]
    dst = edge_index[1]
    a = jnp.zeros((num_nodes, num_nodes), jnp.float32)
    a = a.at[dst, src].add(1.0)
    a = a + jnp.eye(num_nodes, dtype=jnp.float32)          # self-loops
    deg = jnp.sum(a, axis=1)
    dinv_sqrt = jnp.where(deg > 0, jax.lax.rsqrt(deg), 0.0)
    return dinv_sqrt[:, None] * a * dinv_sqrt[None, :]


def _pad2(x, rows, cols):
    r, c = x.shape
    return jnp.pad(x, ((0, rows - r), (0, cols - c)))


def _pad_nodes(n, tile=512):
    """Pad node dim to 128 for small graphs, to a multiple of `tile` otherwise,
    so _choose_tile never collapses the N^2 matmul to 128x128 tiles."""
    n128 = _round_up(n, 128)
    return n128 if n128 <= tile else _round_up(n, tile)


def glorot(key, shape):
    fan_in, fan_out = shape
    limit = jnp.sqrt(6.0 / (fan_in + fan_out))
    return jax.random.uniform(key, shape, jnp.float32, -limit, limit)


def init_gcn_params(key, in_channels, hidden_channels, conv_number, out_channels):
    """Mirrors GCN.__init__: conv1, (conv_number-2) hidden layers, conv2."""
    dims = [in_channels] + [hidden_channels] * (conv_number - 1) + [out_channels]
    params = []
    for k in range(conv_number):
        key, wk = jax.random.split(key)
        w = glorot(wk, (dims[k], dims[k + 1]))
        b = jnp.zeros((dims[k + 1],), jnp.float32)          # GCNConv bias: zeros
        params.append((w, b))
    return params


def gcn_forward(x, edge_index, params):
    """Matches GCN.forward: ReLU after every layer except the last."""
    n, c_in = x.shape
    c_out_final = params[-1][0].shape[1]

    a_hat = build_normalized_adjacency(edge_index, n)

    # Pad node dim to a multiple of 512 (128 for tiny graphs) and channel dims
    # to multiples of 128: lane-dense tiles, full MXU occupancy, unmasked
    # stores.  Zero padding is exact: padded rows/cols contribute nothing.
    # (Channels stay 128-padded on purpose: the A_hat matmul is HBM-bound, so
    # padding channels further would only add traffic.)
    n_pad = _pad_nodes(n)
    a_p = _pad2(a_hat, n_pad, n_pad).astype(jnp.bfloat16)
    h = _pad2(x, n_pad, _round_up(c_in, 128)).astype(jnp.bfloat16)

    n_layers = len(params)
    for i, (w, b) in enumerate(params):
        ci, co = w.shape
        ci_p, co_p = _round_up(ci, 128), _round_up(co, 128)
        w_p = _pad2(w, ci_p, co_p).astype(jnp.bfloat16)
        b_p = jnp.pad(b, (0, co_p - co))
        is_last = i == n_layers - 1
        h = gcn_conv(a_p, h, w_p, b_p,
                     apply_relu=not is_last,
                     out_dtype=jnp.float32 if is_last else jnp.bfloat16)
    return h[:n, :c_out_final]


# ----------------------------------- main ------------------------------------
if __name__ == "__main__":
    # ---- GCN forward on a small deterministic graph --------------------------
    num_nodes = 16
    in_channels = 4
    hidden_channels = 32
    conv_number = 3        # conv1 + 1 hidden layer + conv2
    out_channels = 8
    num_edges = 40

    key = jax.random.PRNGKey(0)
    kx, ke_src, ke_dst, kp, ka, kb = jax.random.split(key, 6)

    x = jax.random.normal(kx, (num_nodes, in_channels), jnp.float32)
    edge_index = jnp.stack([
        jax.random.randint(ke_src, (num_edges,), 0, num_nodes),
        jax.random.randint(ke_dst, (num_edges,), 0, num_nodes),
    ]).astype(jnp.int32)

    params = init_gcn_params(kp, in_channels, hidden_channels,
                             conv_number, out_channels)

    fwd = jax.jit(gcn_forward)
    out = jax.block_until_ready(fwd(x, edge_index, params))

    # Pure-f32 JAX reference of the same math (kernel streams bf16, so use a
    # tolerance commensurate with bf16 operand precision).
    a_hat = build_normalized_adjacency(edge_index, num_nodes)
    ref = x
    for i, (w, b) in enumerate(params):
        ref = a_hat @ (ref @ w) + b
        if i < len(params) - 1:
            ref = jnp.maximum(ref, 0.0)

    assert out.shape == (num_nodes, out_channels)
    assert out.dtype == jnp.float32
    assert bool(jnp.allclose(out, ref, atol=5e-2, rtol=5e-2)), (
        "max abs err", float(jnp.max(jnp.abs(out - ref))))

    # ---- Sanity-check the multi-reduction-step (scratch accumulator) path ----
    M, K, N = 256, 4096, 128
    am = jax.random.normal(ka, (M, K), jnp.float32).astype(jnp.bfloat16)
    bm = jax.random.normal(kb, (K, N), jnp.float32).astype(jnp.bfloat16)
    got = jax.block_until_ready(
        jax.jit(functools.partial(fused_matmul, apply_relu=True,
                                  out_dtype=jnp.float32, tk_pref=1024))(am, bm))
    want = jnp.maximum(
        jnp.dot(am.astype(jnp.float32), bm.astype(jnp.float32)), 0.0)
    assert bool(jnp.allclose(got, want, atol=1.0, rtol=2e-2)), (
        "multi-k max abs err", float(jnp.max(jnp.abs(got - want))))

    print("KERNEL_OK")
</pallas_src>

<mosaic_0001>
module attributes {stable_mosaic.version = 11 : i64} {
  func.func @_fused_matmul_kernel(%arg0: i32, %arg1: i32, %arg2: memref<128x128xbf16, #tpu.memory_space<vmem>>, %arg3: memref<128x128xbf16, #tpu.memory_space<vmem>>, %arg4: memref<128x128xbf16, #tpu.memory_space<vmem>>) attributes {dimension_semantics = [#tpu.dimension_semantics<parallel>, #tpu.dimension_semantics<parallel>], iteration_bounds = array<i64: 1, 1>, scalar_prefetch = 0 : i64, scratch_operands = 0 : i64, tpu.core_type = #tpu.core_type<tc>, window_params = [{transform_indices = @transform_0, window_bounds = array<i64: 128, 128>}, {transform_indices = @transform_1, window_bounds = array<i64: 128, 128>}, {transform_indices = @transform_2, window_bounds = array<i64: 128, 128>}]} {
    %c0 = arith.constant 0 : index
    %c0_0 = arith.constant 0 : index
    %0 = vector.load %arg2[%c0, %c0_0] : memref<128x128xbf16, #tpu.memory_space<vmem>>, vector<128x128xbf16>
    %c0_1 = arith.constant 0 : index
    %c0_2 = arith.constant 0 : index
    %1 = vector.load %arg3[%c0_1, %c0_2] : memref<128x128xbf16, #tpu.memory_space<vmem>>, vector<128x128xbf16>
    %cst = arith.constant dense<0.000000e+00> : vector<128x128xf32>
    %2 = tpu.matmul %0, %1, %cst {dimension_numbers = #tpu.dot_dimension_numbers<[1], [0], [0], [1], [0, 0, 1, 1], [], []>} : vector<128x128xbf16>, vector<128x128xbf16>, vector<128x128xf32> -> vector<128x128xf32>
    %3 = arith.truncf %2 : vector<128x128xf32> to vector<128x128xbf16>
    %c0_3 = arith.constant 0 : index
    %c0_4 = arith.constant 0 : index
    %4 = vector.load %arg4[%c0_3, %c0_4] : memref<128x128xbf16, #tpu.memory_space<vmem>>, vector<128x128xbf16>
    tpu.vector_store %arg4[%c0_3, %c0_4], %3 {strides = array<i32>} : memref<128x128xbf16, #tpu.memory_space<vmem>>, vector<128x128xbf16>,
    return
  }
  func.func @transform_0(%arg0: i32, %arg1: i32) -> (i32, i32) {
    %c0_i32 = arith.constant 0 : i32
    %c0_i32_0 = arith.constant 0 : i32
    return %arg0, %c0_i32 : i32, i32
  }
  func.func @transform_1(%arg0: i32, %arg1: i32) -> (i32, i32) {
    %c0_i32 = arith.constant 0 : i32
    %c0_i32_0 = arith.constant 0 : i32
    return %c0_i32, %arg1 : i32, i32
  }
  func.func @transform_2(%arg0: i32, %arg1: i32) -> (i32, i32) {
    %c0_i32 = arith.constant 0 : i32
    return %arg0, %arg1 : i32, i32
  }
}

module attributes {stable_mosaic.version = 11 : i64} {
  func.func @_fused_matmul_kernel(%arg0: i32, %arg1: i32, %arg2: memref<128x128xbf16, #tpu.memory_space<vmem>>, %arg3: memref<128x128xbf16, #tpu.memory_space<vmem>>, %arg4: memref<1x128xf32, #tpu.memory_space<vmem>>, %arg5: memref<128x128xbf16, #tpu.memory_space<vmem>>) attributes {dimension_semantics = [#tpu.dimension_semantics<parallel>, #tpu.dimension_semantics<parallel>], iteration_bounds = array<i64: 1, 1>, scalar_prefetch = 0 : i64, scratch_operands = 0 : i64, tpu.core_type = #tpu.core_type<tc>, window_params = [{transform_indices = @transform_0, window_bounds = array<i64: 128, 128>}, {transform_indices = @transform_1, window_bounds = array<i64: 128, 128>}, {transform_indices = @transform_2, window_bounds = array<i64: 1, 128>}, {transform_indices = @transform_3, window_bounds = array<i64: 128, 128>}]} {
    %c0 = arith.constant 0 : index
    %c0_0 = arith.constant 0 : index
    %0 = vector.load %arg2[%c0, %c0_0] : memref<128x128xbf16, #tpu.memory_space<vmem>>, vector<128x128xbf16>
    %c0_1 = arith.constant 0 : index
    %c0_2 = arith.constant 0 : index
    %1 = vector.load %arg3[%c0_1, %c0_2] : memref<128x128xbf16, #tpu.memory_space<vmem>>, vector<128x128xbf16>
    %cst = arith.constant dense<0.000000e+00> : vector<128x128xf32>
    %2 = tpu.matmul %0, %1, %cst {dimension_numbers = #tpu.dot_dimension_numbers<[1], [0], [0], [1], [0, 0, 1, 1], [], []>} : vector<128x128xbf16>, vector<128x128xbf16>, vector<128x128xf32> -> vector<128x128xf32>
    %c0_3 = arith.constant 0 : index
    %c0_4 = arith.constant 0 : index
    %3 = vector.load %arg4[%c0_3, %c0_4] : memref<1x128xf32, #tpu.memory_space<vmem>>, vector<1x128xf32>
    %4 = vector.broadcast %3 : vector<1x128xf32> to vector<128x128xf32>
    %5 = arith.addf %2, %4 : vector<128x128xf32>
    %cst_5 = arith.constant 0.000000e+00 : f32
    %6 = vector.broadcast %cst_5 : f32 to vector<128x128xf32>
    %7 = arith.maximumf %5, %6 : vector<128x128xf32>
    %8 = arith.truncf %7 : vector<128x128xf32> to vector<128x128xbf16>
    %c0_6 = arith.constant 0 : index
    %c0_7 = arith.constant 0 : index
    %9 = vector.load %arg5[%c0_6, %c0_7] : memref<128x128xbf16, #tpu.memory_space<vmem>>, vector<128x128xbf16>
    tpu.vector_store %arg5[%c0_6, %c0_7], %8 {strides = array<i32>} : memref<128x128xbf16, #tpu.memory_space<vmem>>, vector<128x128xbf16>,
    return
  }
  func.func @transform_0(%arg0: i32, %arg1: i32) -> (i32, i32) {
    %c0_i32 = arith.constant 0 : i32
    %c0_i32_0 = arith.constant 0 : i32
    return %arg0, %c0_i32 : i32, i32
  }
  func.func @transform_1(%arg0: i32, %arg1: i32) -> (i32, i32) {
    %c0_i32 = arith.constant 0 : i32
    %c0_i32_0 = arith.constant 0 : i32
    return %c0_i32, %arg1 : i32, i32
  }
  func.func @transform_2(%arg0: i32, %arg1: i32) -> (i32, i32) {
    %c0_i32 = arith.constant 0 : i32
    %c0_i32_0 = arith.constant 0 : i32
    return %c0_i32, %arg1 : i32, i32
  }
  func.func @transform_3(%arg0: i32, %arg1: i32) -> (i32, i32) {
    %c0_i32 = arith.constant 0 : i32
    return %arg0, %arg1 : i32, i32
  }
}

module attributes {stable_mosaic.version = 11 : i64} {
  func.func @_fused_matmul_kernel(%arg0: i32, %arg1: i32, %arg2: memref<128x128xbf16, #tpu.memory_space<vmem>>, %arg3: memref<128x128xbf16, #tpu.memory_space<vmem>>, %arg4: memref<1x128xf32, #tpu.memory_space<vmem>>, %arg5: memref<128x128xf32, #tpu.memory_space<vmem>>) attributes {dimension_semantics = [#tpu.dimension_semantics<parallel>, #tpu.dimension_semantics<parallel>], iteration_bounds = array<i64: 1, 1>, scalar_prefetch = 0 : i64, scratch_operands = 0 : i64, tpu.core_type = #tpu.core_type<tc>, window_params = [{transform_indices = @transform_0, window_bounds = array<i64: 128, 128>}, {transform_indices = @transform_1, window_bounds = array<i64: 128, 128>}, {transform_indices = @transform_2, window_bounds = array<i64: 1, 128>}, {transform_indices = @transform_3, window_bounds = array<i64: 128, 128>}]} {
    %c0 = arith.constant 0 : index
    %c0_0 = arith.constant 0 : index
    %0 = vector.load %arg2[%c0, %c0_0] : memref<128x128xbf16, #tpu.memory_space<vmem>>, vector<128x128xbf16>
    %c0_1 = arith.constant 0 : index
    %c0_2 = arith.constant 0 : index
    %1 = vector.load %arg3[%c0_1, %c0_2] : memref<128x128xbf16, #tpu.memory_space<vmem>>, vector<128x128xbf16>
    %cst = arith.constant dense<0.000000e+00> : vector<128x128xf32>
    %2 = tpu.matmul %0, %1, %cst {dimension_numbers = #tpu.dot_dimension_numbers<[1], [0], [0], [1], [0, 0, 1, 1], [], []>} : vector<128x128xbf16>, vector<128x128xbf16>, vector<128x128xf32> -> vector<128x128xf32>
    %c0_3 = arith.constant 0 : index
    %c0_4 = arith.constant 0 : index
    %3 = vector.load %arg4[%c0_3, %c0_4] : memref<1x128xf32, #tpu.memory_space<vmem>>, vector<1x128xf32>
    %4 = vector.broadcast %3 : vector<1x128xf32> to vector<128x128xf32>
    %5 = arith.addf %2, %4 : vector<128x128xf32>
    %c0_5 = arith.constant 0 : index
    %c0_6 = arith.constant 0 : index
    %6 = vector.load %arg5[%c0_5, %c0_6] : memref<128x128xf32, #tpu.memory_space<vmem>>, vector<128x128xf32>
    tpu.vector_store %arg5[%c0_5, %c0_6], %5 {strides = array<i32>} : memref<128x128xf32, #tpu.memory_space<vmem>>, vector<128x128xf32>,
    return
  }
  func.func @transform_0(%arg0: i32, %arg1: i32) -> (i32, i32) {
    %c0_i32 = arith.constant 0 : i32
    %c0_i32_0 = arith.constant 0 : i32
    return %arg0, %c0_i32 : i32, i32
  }
  func.func @transform_1(%arg0: i32, %arg1: i32) -> (i32, i32) {
    %c0_i32 = arith.constant 0 : i32
    %c0_i32_0 = arith.constant 0 : i32
    return %c0_i32, %arg1 : i32, i32
  }
  func.func @transform_2(%arg0: i32, %arg1: i32) -> (i32, i32) {
    %c0_i32 = arith.constant 0 : i32
    %c0_i32_0 = arith.constant 0 : i32
    return %c0_i32, %arg1 : i32, i32
  }
  func.func @transform_3(%arg0: i32, %arg1: i32) -> (i32, i32) {
    %c0_i32 = arith.constant 0 : i32
    return %arg0, %arg1 : i32, i32
  }
}

</mosaic_0001>

<bundles_post_ra>
// kernel: gcn_forward.7
= control target key start
LH: loop header
LB: loop body
LE: loop exit
PB: predicated region body
PF: predicated region fallthrough
CT: control target
= control target key end

     0   :  { %8 = vsyncpa [#allocation3], 0  ;;  %s767_s0 = inlined_call_operand.hbm [shape: bf16[128,128], index: 0, kind: input, shape index: {}]   ;;  %s768_s1 = inlined_call_operand.hbm [shape: bf16[128,128], index: 1, kind: input, shape index: {}]   ;;  %s769_s2 = inlined_call_operand.hbm [shape: f32[1,128], index: 2, kind: input, shape index: {}]   ;;  %s770_s3 = inlined_call_operand.hbm [shape: bf16[128,128], index: 3, kind: output, shape index: {}]  }
   0x1   :  { %9 = vsyncpa [#allocation6], 0 }
   0x2   :  { %10 = vsyncpa [#allocation4], 0  ;;  %s677_s12 = smov [#allocation5]   ;;  %s678_s14 = smov [#allocation2]  }
   0x3   :  { %s28_s13 = sshll.u32 %s677_s12, 4  ;;  %s16_s15 = sshll.u32 %s678_s14, 4  ;;  %s29_s13 = int_to_ptr.vmem [resolvable:$true] %s28_s13  ;;  %s703_s15 = int_to_ptr.vmem [resolvable:$true] %s16_s15 }
   0x4   :  { %s583_s18 = scalar_lea.hbm %s768_s1, 1024 }
   0x5   :  { %p584_p0 = scmp.ne.s32.totalorder %s768_s1, %s583_s18  ;;  %p587_p1 = scmp.lt.u32.totalorder %s583_s18, %s768_s1 }
   0x7   :  { %p589_p2 = pnand %p587_p1, %p584_p0 }
   0x9   :  { %592 = shalt.err (!%p589_p2)
}
   0xa   :  { %s593_s23 = scalar_lea.vmem %s29_s13, 1024  ;;  %p598_p4 = scmp.lt.s32.totalorder %s29_s13, %s29_s13 }
   0xb   :  { %p594_p3 = scmp.ne.s32.totalorder %s29_s13, %s593_s23  ;;  %p599_p5 = scmp.lt.s32.totalorder %s593_s23, %s593_s23 }
   0xd   :  { %p600_p6 = por %p599_p5, %p598_p4 }
   0xf   :  { %p601_p7 = pnand %p600_p6, %p594_p3 }
  0x11   :  { %604 = shalt.err (!%p601_p7)
}
  0x12   :  { %s679_s24 = smov 64   ;;  %s680_s25 = smov 4  }
  0x13   :  { %34 = dma.hbm_to_vmem [thread:$0]  %s768_s1, 1024, %s29_s13, [#allocation6], %s679_s24, %s679_s24, %s680_s25  }
  0x14   :  { %s605_s30 = scalar_lea.hbm %s767_s0, 1024 }
  0x15   :  { %p606_p8 = scmp.ne.s32.totalorder %s767_s0, %s605_s30  ;;  %p609_p9 = scmp.lt.u32.totalorder %s605_s30, %s767_s0 }
  0x17   :  { %p611_p10 = pnand %p609_p9, %p606_p8 }
  0x19   :  { %614 = shalt.err (!%p611_p10)
}
  0x1a   :  { %s615_s8 = scalar_lea.vmem %s703_s15, 1024  ;;  %p620_p12 = scmp.lt.s32.totalorder %s703_s15, %s703_s15 }
  0x1b   :  { %p616_p11 = scmp.ne.s32.totalorder %s703_s15, %s615_s8  ;;  %p621_p13 = scmp.lt.s32.totalorder %s615_s8, %s615_s8 }
  0x1d   :  { %p622_p0 = por %p621_p13, %p620_p12 }
  0x1f   :  { %p623_p1 = pnand %p622_p0, %p616_p11 }
  0x21   :  { %626 = shalt.err (!%p623_p1)
}
  0x22   :  { %22 = dma.hbm_to_vmem [thread:$0]  %s767_s0, 1024, %s703_s15, [#allocation3], %s679_s24, %s679_s24, %s680_s25  }
  0x23   :  { %s681_s10 = smov [#allocation7]   ;;  %s627_s14 = scalar_lea.hbm %s769_s2, 16 }
  0x24   :  { %s41_s11 = sshll.u32 %s681_s10, 4  ;;  %p628_p2 = scmp.ne.s32.totalorder %s769_s2, %s627_s14  ;;  %s42_s11 = int_to_ptr.vmem [resolvable:$true] %s41_s11 }
  0x25   :  { %p631_p3 = scmp.lt.u32.totalorder %s627_s14, %s769_s2 }
  0x27   :  { %p633_p4 = pnand %p631_p3, %p628_p2 }
  0x29   :  { %636 = shalt.err (!%p633_p4)
}
  0x2a   :  { %s637_s20 = scalar_lea.vmem %s42_s11, 16  ;;  %s641_s0 = scalar_lea.vmem %s42_s11, 32 }
  0x2b   :  { %p638_p5 = scmp.ne.s32.totalorder %s42_s11, %s637_s20  ;;  %p642_p6 = scmp.lt.s32.totalorder %s42_s11, %s42_s11 }
  0x2c   :  { %p643_p7 = scmp.lt.s32.totalorder %s641_s0, %s637_s20 }
  0x2e   :  { %p644_p8 = por %p643_p7, %p642_p6 }
  0x30   :  { %p645_p9 = pnand %p644_p8, %p638_p5 }
  0x32   :  { %648 = shalt.err (!%p645_p9)
}
  0x33   :  { %44 = dma.hbm_to_vmem [thread:$0]  %s769_s2, 16, %s42_s11, [#allocation6]  }
  0x34   :  { %671 = dma.done.wait [#allocation3], 1024  }
  0x35   :  { %672 = vsyncadd [#allocation3], 4294966272 }
  0x36   :  { %673 = dma.done.wait [#allocation6], 1040  }
  0x37   :  { %674 = vsyncadd [#allocation6], 4294966256  ;;  %v567_v0 = vld [vmem:[#allocation5] sm:$0xff]   ;;  %v568_v1 = vld [vmem:[#allocation5 + $0x8] sm:$0xff]   ;;  %s682_s2 = smov [#allocation8]  }
  0x38   :  { %513 = vmatprep.subr.bf16.mxu0 %v567_v0  ;;  %545 = vmatprep.subr.bf16.mxu1 %v567_v0  ;;  %v569_v2 = vld [vmem:[#allocation5 + $0x10] sm:$0xff]   ;;  %v570_v3 = vld [vmem:[#allocation5 + $0x18] sm:$0xff]   ;;  %v575_v4 = vld [vmem:[#allocation2] sm:$0xff]   ;;  %s388_s22 = sshll.u32 %s682_s2, 4  ;;  %s389_s22 = int_to_ptr.vmem [resolvable:$true] %s388_s22 }
  0x39   :  { %514 = vmatpush3.bf16.msra.mxu0 %v567_v0  ;;  %553 = vmatpush3.bf16.msra.mxu1 %v567_v0  ;;  %v576_v5 = vld [vmem:[#allocation2 + $0x20] sm:$0xff]   ;;  %v572_v7 = vld [vmem:[#allocation5 + $0x28] sm:$0xff]   ;;  %v573_v8 = vld [vmem:[#allocation5 + $0x30] sm:$0xff]   ;;  %s649_s23 = scalar_lea.vmem %s389_s22, 1024  ;;  %p654_p11 = scmp.lt.s32.totalorder %s389_s22, %s389_s22 }
  0x3a   :  { %515 = vmatprep.subr.bf16.mxu0 %v568_v1  ;;  %546 = vmatprep.subr.bf16.mxu1 %v568_v1  ;;  %v571_v6 = vld [vmem:[#allocation5 + $0x20] sm:$0xff]   ;;  %v574_v9 = vld [vmem:[#allocation5 + $0x38] sm:$0xff]   ;;  %v577_v10 = vld [vmem:[#allocation2 + $0x8] sm:$0xff]   ;;  %p650_p10 = scmp.ne.s32.totalorder %s389_s22, %s649_s23  ;;  %p655_p12 = scmp.lt.s32.totalorder %s649_s23, %s649_s23 }
  0x3b   :  { %529 = vmatprep.mubr.bf16.mxu0 %v575_v4  ;;  %537 = vmatprep.mubr.bf16.mxu1 %v576_v5  ;;  %v578_v11 = vld [vmem:[#allocation2 + $0x28] sm:$0xff]   ;;  %v579_v12 = vld [vmem:[#allocation2 + $0x10] sm:$0xff]   ;;  %v581_v14 = vld [vmem:[#allocation2 + $0x18] sm:$0xff]  }
  0x3c   :  { %v580_v13 = vld [vmem:[#allocation2 + $0x30] sm:$0xff]   ;;  %v582_v15 = vld [vmem:[#allocation2 + $0x38] sm:$0xff]   ;;  %v401_v16 = vld [vmem:[#allocation7] ss:$0 sm:$0xff]  ;;  %p656_p13 = por %p655_p12, %p654_p11 }
  0x3d   :  { %516 = vmatpush3.bf16.msra.mxu0 %v568_v1  ;;  %554 = vmatpush3.bf16.msra.mxu1 %v568_v1 }
  0x3e   :  { %517 = vmatprep.subr.bf16.mxu0 %v569_v2  ;;  %547 = vmatprep.subr.bf16.mxu1 %v569_v2  ;;  %p657_p0 = pnand %p656_p13, %p650_p10 }
  0x41   :  { %518 = vmatpush3.bf16.msra.mxu0 %v569_v2  ;;  %555 = vmatpush3.bf16.msra.mxu1 %v569_v2 }
  0x42   :  { %519 = vmatprep.subr.bf16.mxu0 %v570_v3  ;;  %548 = vmatprep.subr.bf16.mxu1 %v570_v3 }
  0x45   :  { %520 = vmatpush3.bf16.msra.mxu0 %v570_v3  ;;  %556 = vmatpush3.bf16.msra.mxu1 %v570_v3 }
  0x46   :  { %521 = vmatprep.subr.bf16.mxu0 %v571_v6  ;;  %549 = vmatprep.subr.bf16.mxu1 %v571_v6 }
  0x49   :  { %522 = vmatpush3.bf16.msra.mxu0 %v571_v6  ;;  %557 = vmatpush3.bf16.msra.mxu1 %v571_v6 }
  0x4a   :  { %523 = vmatprep.subr.bf16.mxu0 %v572_v7  ;;  %550 = vmatprep.subr.bf16.mxu1 %v572_v7 }
  0x4d   :  { %524 = vmatpush3.bf16.msra.mxu0 %v572_v7  ;;  %558 = vmatpush3.bf16.msra.mxu1 %v572_v7 }
  0x4e   :  { %525 = vmatprep.subr.bf16.mxu0 %v573_v8  ;;  %551 = vmatprep.subr.bf16.mxu1 %v573_v8 }
  0x51   :  { %526 = vmatpush3.bf16.msra.mxu0 %v573_v8  ;;  %559 = vmatpush3.bf16.msra.mxu1 %v573_v8 }
  0x52   :  { %527 = vmatprep.subr.bf16.mxu0 %v574_v9  ;;  %552 = vmatprep.subr.bf16.mxu1 %v574_v9 }
  0x55   :  { %528 = vmatpush3.bf16.msra.mxu0 %v574_v9  ;;  %560 = vmatpush3.bf16.msra.mxu1 %v574_v9 }
  0x58   :  { %530 = vmatmul.mubr.bf16.vlgmr.msra.gmra.mrb[0].mxu0 %v577_v10  ;;  %538 = vmatmul.mubr.bf16.vlgmr.msra.gmra.mrb[0].mxu1 %v578_v11 }
  0x59   :  { %533 = vmatprep.mubr.bf16.mxu0 %v579_v12  ;;  %541 = vmatprep.mubr.bf16.mxu1 %v580_v13 }
  0x60   :  { %534 = vmatmul.mubr.bf16.gmra.mrb[4].mxu0 %v581_v14  ;;  %542 = vmatmul.mubr.bf16.gmra.mrb[4].mxu1 %v582_v15 }
 0x12b   :  { %v531_v17 = vpop.f32.mrb[0].mxu0  ;;  %v539_v18 = vpop.f32.mrb[0].mxu1 }
 0x12c   :  { %v233_v19 = vadd.f32 %v531_v17, %v401_v16  ;;  %v265_v20 = vadd.f32 %v539_v18, %v401_v16  ;;  %v224_v21 = vpop.f32.mrb[1].mxu0  ;;  %v256_v22 = vpop.f32.mrb[1].mxu1 }
 0x12d   :  { %v225_v23 = vadd.f32 %v401_v16, %v224_v21  ;;  %v257_v24 = vadd.f32 %v401_v16, %v256_v22  ;;  %v532_v25 = vpop.f32.mrb[2].mxu0  ;;  %v540_v26 = vpop.f32.mrb[2].mxu1 }
 0x12e   :  { %v236_v27 = vadd.f32 %v532_v25, %v401_v16  ;;  %v268_v28 = vadd.f32 %v540_v26, %v401_v16  ;;  %v227_v29 = vpop.f32.mrb[3].mxu0  ;;  %v259_v30 = vpop.f32.mrb[3].mxu1  ;;  %v289_v33 = vmax.f32 %v233_v19, 0.0  ;;  %v297_v34 = vmax.f32 %v265_v20, 0.0 }
 0x12f   :  { %v228_v31 = vadd.f32 %v401_v16, %v227_v29  ;;  %v260_v32 = vadd.f32 %v401_v16, %v259_v30  ;;  %v287_v37 = vmax.f32 %v225_v23, 0.0  ;;  %v295_v38 = vmax.f32 %v257_v24, 0.0 }
 0x130   :  { %v290_v35 = vmax.f32 %v236_v27, 0.0  ;;  %v298_v36 = vmax.f32 %v268_v28, 0.0 }
 0x131   :  { %v288_v39 = vmax.f32 %v228_v31, 0.0  ;;  %v296_v40 = vmax.f32 %v260_v32, 0.0 }
 0x132   :  { %v458_v41 = vpack.c.bf16 %v290_v35, %v289_v33  ;;  %v478_v42 = vpack.c.bf16 %v298_v36, %v297_v34 }
 0x133   :  { %v453_v43 = vpack.c.bf16 %v288_v39, %v287_v37  ;;  %v473_v44 = vpack.c.bf16 %v296_v40, %v295_v38  ;;  %v535_v45 = vpop.f32.mrb[4].mxu0  ;;  %v543_v46 = vpop.f32.mrb[4].mxu1 }
 0x134   :  { %490 = vst [vmem:[#allocation8 + $0x8] sm:$0xff] %v458_v41   ;;  %494 = vst [vmem:[#allocation8 + $0x28] sm:$0xff] %v478_v42   ;;  %v249_v47 = vadd.f32 %v535_v45, %v401_v16  ;;  %v281_v48 = vadd.f32 %v543_v46, %v401_v16  ;;  %v240_v49 = vpop.f32.mrb[5].mxu0  ;;  %v272_v50 = vpop.f32.mrb[5].mxu1 }
 0x135   :  { %454 = vst [vmem:[#allocation8] sm:$0xff] %v453_v43   ;;  %493 = vst [vmem:[#allocation8 + $0x20] sm:$0xff] %v473_v44   ;;  %v241_v51 = vadd.f32 %v401_v16, %v240_v49  ;;  %v273_v52 = vadd.f32 %v401_v16, %v272_v50  ;;  %v536_v53 = vpop.f32.mrb[6].mxu0  ;;  %v544_v54 = vpop.f32.mrb[6].mxu1 }
 0x136   :  { %v252_v55 = vadd.f32 %v536_v53, %v401_v16  ;;  %v284_v56 = vadd.f32 %v544_v54, %v401_v16  ;;  %v243_v57 = vpop.f32.mrb[7].mxu0  ;;  %v275_v58 = vpop.f32.mrb[7].mxu1  ;;  %v293_v61 = vmax.f32 %v249_v47, 0.0  ;;  %v301_v62 = vmax.f32 %v281_v48, 0.0 }
 0x137   :  { %v244_v59 = vadd.f32 %v401_v16, %v243_v57  ;;  %v276_v60 = vadd.f32 %v401_v16, %v275_v58  ;;  %v291_v1 = vmax.f32 %v241_v51, 0.0  ;;  %v299_v2 = vmax.f32 %v273_v52, 0.0 }
 0x138   :  { %v294_v63 = vmax.f32 %v252_v55, 0.0  ;;  %v302_v0 = vmax.f32 %v284_v56, 0.0 }
 0x139   :  { %v292_v3 = vmax.f32 %v244_v59, 0.0  ;;  %v300_v4 = vmax.f32 %v276_v60, 0.0 }
 0x13a   :  { %v468_v5 = vpack.c.bf16 %v294_v63, %v293_v61  ;;  %v488_v6 = vpack.c.bf16 %v302_v0, %v301_v62 }
 0x13b   :  { %v463_v7 = vpack.c.bf16 %v292_v3, %v291_v1  ;;  %v483_v8 = vpack.c.bf16 %v300_v4, %v299_v2 }
 0x13c   :  { %492 = vst [vmem:[#allocation8 + $0x18] sm:$0xff] %v468_v5   ;;  %496 = vst [vmem:[#allocation8 + $0x38] sm:$0xff] %v488_v6  }
 0x13d   :  { %491 = vst [vmem:[#allocation8 + $0x10] sm:$0xff] %v463_v7   ;;  %495 = vst [vmem:[#allocation8 + $0x30] sm:$0xff] %v483_v8  }
 0x13e   :  { %660 = shalt.err (!%p657_p0)
}
 0x13f   :  { %s661_s28 = scalar_lea.hbm %s770_s3, 1024 }
 0x140   :  { %p662_p1 = scmp.ne.s32.totalorder %s770_s3, %s661_s28  ;;  %p665_p2 = scmp.lt.u32.totalorder %s661_s28, %s770_s3 }
 0x142   :  { %p667_p3 = pnand %p665_p2, %p662_p1 }
 0x144   :  { %670 = shalt.err (!%p667_p3)
}
 0x145   :  { %394 = dma.vmem_to_hbm [thread:$0]  %s389_s22, 1024, %s770_s3, [#allocation4], %s679_s24, %s679_s24, %s680_s25  }
 0x146   :  { %675 = dma.done.wait [#allocation4], 1024  }
 0x147   :  { %676 = vsyncadd [#allocation4], 4294966272 }
 0x148   :  { %398 = vsyncpa [#allocation3], 1 }
 0x149   :  { %399 = vsyncpa [#allocation6], 1 }
 0x14a   :  { %400 = vsyncpa [#allocation4], 1 }

// kernel: gcn_forward.6
= control target key start
LH: loop header
LB: loop body
LE: loop exit
PB: predicated region body
PF: predicated region fallthrough
CT: control target
= control target key end

     0   :  { %7 = vsyncpa [#allocation3], 0  ;;  %s681_s0 = inlined_call_operand.hbm [shape: bf16[128,128], index: 0, kind: input, shape index: {}]   ;;  %s682_s1 = inlined_call_operand.hbm [shape: bf16[128,128], index: 1, kind: input, shape index: {}]   ;;  %s683_s2 = inlined_call_operand.hbm [shape: bf16[128,128], index: 2, kind: output, shape index: {}]  }
   0x1   :  { %8 = vsyncpa [#allocation6], 0 }
   0x2   :  { %9 = vsyncpa [#allocation4], 0  ;;  %s616_s9 = smov [#allocation2]   ;;  %s544_s13 = scalar_lea.hbm %s681_s0, 1024 }
   0x3   :  { %s15_s10 = sshll.u32 %s616_s9, 4  ;;  %p545_p0 = scmp.ne.s32.totalorder %s681_s0, %s544_s13  ;;  %s16_s10 = int_to_ptr.vmem [resolvable:$true] %s15_s10 }
   0x4   :  { %p548_p1 = scmp.lt.u32.totalorder %s544_s13, %s681_s0 }
   0x6   :  { %p550_p2 = pnand %p548_p1, %p545_p0 }
   0x8   :  { %553 = shalt.err (!%p550_p2)
}
   0x9   :  { %s554_s18 = scalar_lea.vmem %s16_s10, 1024  ;;  %p559_p4 = scmp.lt.s32.totalorder %s16_s10, %s16_s10 }
   0xa   :  { %p555_p3 = scmp.ne.s32.totalorder %s16_s10, %s554_s18  ;;  %p560_p5 = scmp.lt.s32.totalorder %s554_s18, %s554_s18 }
   0xc   :  { %p561_p6 = por %p560_p5, %p559_p4 }
   0xe   :  { %p562_p7 = pnand %p561_p6, %p555_p3 }
  0x10   :  { %565 = shalt.err (!%p562_p7)
}
  0x11   :  { %s617_s19 = smov 64   ;;  %s618_s20 = smov 4  }
  0x12   :  { %21 = dma.hbm_to_vmem [thread:$0]  %s681_s0, 1024, %s16_s10, [#allocation3], %s617_s19, %s617_s19, %s618_s20  }
  0x13   :  { %s619_s23 = smov [#allocation5]   ;;  %s566_s27 = scalar_lea.hbm %s682_s1, 1024 }
  0x14   :  { %s27_s24 = sshll.u32 %s619_s23, 4  ;;  %p567_p8 = scmp.ne.s32.totalorder %s682_s1, %s566_s27  ;;  %s28_s24 = int_to_ptr.vmem [resolvable:$true] %s27_s24 }
  0x15   :  { %p570_p9 = scmp.lt.u32.totalorder %s566_s27, %s682_s1 }
  0x17   :  { %p572_p10 = pnand %p570_p9, %p567_p8 }
  0x19   :  { %575 = shalt.err (!%p572_p10)
}
  0x1a   :  { %s576_s4 = scalar_lea.vmem %s28_s24, 1024  ;;  %p581_p12 = scmp.lt.s32.totalorder %s28_s24, %s28_s24 }
  0x1b   :  { %p577_p11 = scmp.ne.s32.totalorder %s28_s24, %s576_s4  ;;  %p582_p13 = scmp.lt.s32.totalorder %s576_s4, %s576_s4 }
  0x1d   :  { %p583_p0 = por %p582_p13, %p581_p12 }
  0x1f   :  { %p584_p1 = pnand %p583_p0, %p577_p11 }
  0x21   :  { %587 = shalt.err (!%p584_p1)
}
  0x22   :  { %33 = dma.hbm_to_vmem [thread:$0]  %s682_s1, 1024, %s28_s24, [#allocation6], %s617_s19, %s617_s19, %s618_s20  }
  0x23   :  { %610 = dma.done.wait [#allocation3], 1024  }
  0x24   :  { %611 = vsyncadd [#allocation3], 4294966272 }
  0x25   :  { %612 = dma.done.wait [#allocation6], 1024  }
  0x26   :  { %613 = vsyncadd [#allocation6], 4294966272  ;;  %v528_v0 = vld [vmem:[#allocation5] sm:$0xff]   ;;  %v529_v1 = vld [vmem:[#allocation5 + $0x8] sm:$0xff]   ;;  %s620_s1 = smov [#allocation7]  }
  0x27   :  { %475 = vmatprep.subr.bf16.mxu0 %v528_v0  ;;  %507 = vmatprep.subr.bf16.mxu1 %v528_v0  ;;  %v530_v2 = vld [vmem:[#allocation5 + $0x10] sm:$0xff]   ;;  %v531_v3 = vld [vmem:[#allocation5 + $0x18] sm:$0xff]   ;;  %v536_v4 = vld [vmem:[#allocation2] sm:$0xff]   ;;  %s351_s6 = sshll.u32 %s620_s1, 4  ;;  %s352_s6 = int_to_ptr.vmem [resolvable:$true] %s351_s6 }
  0x28   :  { %476 = vmatpush3.bf16.msra.mxu0 %v528_v0  ;;  %515 = vmatpush3.bf16.msra.mxu1 %v528_v0  ;;  %v537_v5 = vld [vmem:[#allocation2 + $0x20] sm:$0xff]   ;;  %v533_v7 = vld [vmem:[#allocation5 + $0x28] sm:$0xff]   ;;  %v534_v8 = vld [vmem:[#allocation5 + $0x30] sm:$0xff]   ;;  %s588_s7 = scalar_lea.vmem %s352_s6, 1024  ;;  %p593_p3 = scmp.lt.s32.totalorder %s352_s6, %s352_s6 }
  0x29   :  { %477 = vmatprep.subr.bf16.mxu0 %v529_v1  ;;  %508 = vmatprep.subr.bf16.mxu1 %v529_v1  ;;  %v532_v6 = vld [vmem:[#allocation5 + $0x20] sm:$0xff]   ;;  %v535_v9 = vld [vmem:[#allocation5 + $0x38] sm:$0xff]   ;;  %v538_v10 = vld [vmem:[#allocation2 + $0x8] sm:$0xff]   ;;  %p589_p2 = scmp.ne.s32.totalorder %s352_s6, %s588_s7  ;;  %p594_p4 = scmp.lt.s32.totalorder %s588_s7, %s588_s7 }
  0x2a   :  { %491 = vmatprep.mubr.bf16.mxu0 %v536_v4  ;;  %499 = vmatprep.mubr.bf16.mxu1 %v537_v5  ;;  %v539_v11 = vld [vmem:[#allocation2 + $0x28] sm:$0xff]   ;;  %v540_v12 = vld [vmem:[#allocation2 + $0x10] sm:$0xff]   ;;  %v542_v14 = vld [vmem:[#allocation2 + $0x18] sm:$0xff]  }
  0x2b   :  { %v541_v13 = vld [vmem:[#allocation2 + $0x30] sm:$0xff]   ;;  %v543_v15 = vld [vmem:[#allocation2 + $0x38] sm:$0xff]   ;;  %p595_p5 = por %p594_p4, %p593_p3 }
  0x2c   :  { %478 = vmatpush3.bf16.msra.mxu0 %v529_v1  ;;  %516 = vmatpush3.bf16.msra.mxu1 %v529_v1 }
  0x2d   :  { %479 = vmatprep.subr.bf16.mxu0 %v530_v2  ;;  %509 = vmatprep.subr.bf16.mxu1 %v530_v2  ;;  %p596_p6 = pnand %p595_p5, %p589_p2 }
  0x30   :  { %480 = vmatpush3.bf16.msra.mxu0 %v530_v2  ;;  %517 = vmatpush3.bf16.msra.mxu1 %v530_v2 }
  0x31   :  { %481 = vmatprep.subr.bf16.mxu0 %v531_v3  ;;  %510 = vmatprep.subr.bf16.mxu1 %v531_v3 }
  0x34   :  { %482 = vmatpush3.bf16.msra.mxu0 %v531_v3  ;;  %518 = vmatpush3.bf16.msra.mxu1 %v531_v3 }
  0x35   :  { %483 = vmatprep.subr.bf16.mxu0 %v532_v6  ;;  %511 = vmatprep.subr.bf16.mxu1 %v532_v6 }
  0x38   :  { %484 = vmatpush3.bf16.msra.mxu0 %v532_v6  ;;  %519 = vmatpush3.bf16.msra.mxu1 %v532_v6 }
  0x39   :  { %485 = vmatprep.subr.bf16.mxu0 %v533_v7  ;;  %512 = vmatprep.subr.bf16.mxu1 %v533_v7 }
  0x3c   :  { %486 = vmatpush3.bf16.msra.mxu0 %v533_v7  ;;  %520 = vmatpush3.bf16.msra.mxu1 %v533_v7 }
  0x3d   :  { %487 = vmatprep.subr.bf16.mxu0 %v534_v8  ;;  %513 = vmatprep.subr.bf16.mxu1 %v534_v8 }
  0x40   :  { %488 = vmatpush3.bf16.msra.mxu0 %v534_v8  ;;  %521 = vmatpush3.bf16.msra.mxu1 %v534_v8 }
  0x41   :  { %489 = vmatprep.subr.bf16.mxu0 %v535_v9  ;;  %514 = vmatprep.subr.bf16.mxu1 %v535_v9 }
  0x44   :  { %490 = vmatpush3.bf16.msra.mxu0 %v535_v9  ;;  %522 = vmatpush3.bf16.msra.mxu1 %v535_v9 }
  0x47   :  { %492 = vmatmul.mubr.bf16.vlgmr.msra.gmra.mrb[0].mxu0 %v538_v10  ;;  %500 = vmatmul.mubr.bf16.vlgmr.msra.gmra.mrb[0].mxu1 %v539_v11 }
  0x48   :  { %495 = vmatprep.mubr.bf16.mxu0 %v540_v12  ;;  %503 = vmatprep.mubr.bf16.mxu1 %v541_v13 }
  0x4f   :  { %496 = vmatmul.mubr.bf16.gmra.mrb[4].mxu0 %v542_v14  ;;  %504 = vmatmul.mubr.bf16.gmra.mrb[4].mxu1 %v543_v15 }
 0x11a   :  { %v493_v16 = vpop.f32.mrb[0].mxu0  ;;  %v501_v17 = vpop.f32.mrb[0].mxu1 }
 0x11b   :  { %v203_v18 = vpop.f32.mrb[1].mxu0  ;;  %v235_v19 = vpop.f32.mrb[1].mxu1 }
 0x11c   :  { %v494_v20 = vpop.f32.mrb[2].mxu0  ;;  %v502_v21 = vpop.f32.mrb[2].mxu1 }
 0x11d   :  { %v420_v22 = vpack.c.bf16 %v494_v20, %v493_v16  ;;  %v440_v23 = vpack.c.bf16 %v502_v21, %v501_v17  ;;  %v206_v24 = vpop.f32.mrb[3].mxu0  ;;  %v238_v25 = vpop.f32.mrb[3].mxu1 }
 0x11e   :  { %v415_v26 = vpack.c.bf16 %v206_v24, %v203_v18  ;;  %v435_v27 = vpack.c.bf16 %v238_v25, %v235_v19 }
 0x11f   :  { %452 = vst [vmem:[#allocation7 + $0x8] sm:$0xff] %v420_v22   ;;  %456 = vst [vmem:[#allocation7 + $0x28] sm:$0xff] %v440_v23  }
 0x120   :  { %416 = vst [vmem:[#allocation7] sm:$0xff] %v415_v26   ;;  %455 = vst [vmem:[#allocation7 + $0x20] sm:$0xff] %v435_v27  }
 0x122   :  { %v497_v28 = vpop.f32.mrb[4].mxu0  ;;  %v505_v29 = vpop.f32.mrb[4].mxu1 }
 0x123   :  { %v219_v30 = vpop.f32.mrb[5].mxu0  ;;  %v251_v31 = vpop.f32.mrb[5].mxu1 }
 0x124   :  { %v498_v32 = vpop.f32.mrb[6].mxu0  ;;  %v506_v33 = vpop.f32.mrb[6].mxu1 }
 0x125   :  { %v430_v34 = vpack.c.bf16 %v498_v32, %v497_v28  ;;  %v450_v35 = vpack.c.bf16 %v506_v33, %v505_v29  ;;  %v222_v36 = vpop.f32.mrb[7].mxu0  ;;  %v254_v37 = vpop.f32.mrb[7].mxu1 }
 0x126   :  { %v425_v38 = vpack.c.bf16 %v222_v36, %v219_v30  ;;  %v445_v39 = vpack.c.bf16 %v254_v37, %v251_v31 }
 0x127   :  { %454 = vst [vmem:[#allocation7 + $0x18] sm:$0xff] %v430_v34   ;;  %458 = vst [vmem:[#allocation7 + $0x38] sm:$0xff] %v450_v35  }
 0x128   :  { %453 = vst [vmem:[#allocation7 + $0x10] sm:$0xff] %v425_v38   ;;  %457 = vst [vmem:[#allocation7 + $0x30] sm:$0xff] %v445_v39  }
 0x129   :  { %599 = shalt.err (!%p596_p6)
}
 0x12a   :  { %s600_s10 = scalar_lea.hbm %s683_s2, 1024 }
 0x12b   :  { %p601_p7 = scmp.ne.s32.totalorder %s683_s2, %s600_s10  ;;  %p604_p8 = scmp.lt.u32.totalorder %s600_s10, %s683_s2 }
 0x12d   :  { %p606_p9 = pnand %p604_p8, %p601_p7 }
 0x12f   :  { %609 = shalt.err (!%p606_p9)
}
 0x130   :  { %357 = dma.vmem_to_hbm [thread:$0]  %s352_s6, 1024, %s683_s2, [#allocation4], %s617_s19, %s617_s19, %s618_s20  }
 0x131   :  { %614 = dma.done.wait [#allocation4], 1024  }
 0x132   :  { %615 = vsyncadd [#allocation4], 4294966272 }
 0x133   :  { %361 = vsyncpa [#allocation3], 1 }
 0x134   :  { %362 = vsyncpa [#allocation6], 1 }
 0x135   :  { %363 = vsyncpa [#allocation4], 1 }

// kernel: gcn_forward.11
= control target key start
LH: loop header
LB: loop body
LE: loop exit
PB: predicated region body
PF: predicated region fallthrough
CT: control target
= control target key end

     0   :  { %8 = vsyncpa [#allocation3], 0  ;;  %s603_s0 = inlined_call_operand.hbm [shape: bf16[128,128], index: 0, kind: input, shape index: {}]   ;;  %s604_s1 = inlined_call_operand.hbm [shape: bf16[128,128], index: 1, kind: input, shape index: {}]   ;;  %s605_s2 = inlined_call_operand.hbm [shape: f32[1,128], index: 2, kind: input, shape index: {}]   ;;  %s606_s3 = inlined_call_operand.hbm [shape: f32[128,128], index: 3, kind: output, shape index: {}]  }
   0x1   :  { %9 = vsyncpa [#allocation6], 0 }
   0x2   :  { %10 = vsyncpa [#allocation4], 0  ;;  %s520_s12 = smov [#allocation5]   ;;  %s521_s14 = smov [#allocation2]  }
   0x3   :  { %s28_s13 = sshll.u32 %s520_s12, 4  ;;  %s16_s15 = sshll.u32 %s521_s14, 4  ;;  %s29_s13 = int_to_ptr.vmem [resolvable:$true] %s28_s13  ;;  %s548_s15 = int_to_ptr.vmem [resolvable:$true] %s16_s15 }
   0x4   :  { %s426_s18 = scalar_lea.hbm %s604_s1, 1024 }
   0x5   :  { %p427_p0 = scmp.ne.s32.totalorder %s604_s1, %s426_s18  ;;  %p430_p1 = scmp.lt.u32.totalorder %s426_s18, %s604_s1 }
   0x7   :  { %p432_p2 = pnand %p430_p1, %p427_p0 }
   0x9   :  { %435 = shalt.err (!%p432_p2)
}
   0xa   :  { %s436_s23 = scalar_lea.vmem %s29_s13, 1024  ;;  %p441_p4 = scmp.lt.s32.totalorder %s29_s13, %s29_s13 }
   0xb   :  { %p437_p3 = scmp.ne.s32.totalorder %s29_s13, %s436_s23  ;;  %p442_p5 = scmp.lt.s32.totalorder %s436_s23, %s436_s23 }
   0xd   :  { %p443_p6 = por %p442_p5, %p441_p4 }
   0xf   :  { %p444_p7 = pnand %p443_p6, %p437_p3 }
  0x11   :  { %447 = shalt.err (!%p444_p7)
}
  0x12   :  { %s522_s24 = smov 64   ;;  %s523_s25 = smov 4  }
  0x13   :  { %34 = dma.hbm_to_vmem [thread:$0]  %s604_s1, 1024, %s29_s13, [#allocation6], %s522_s24, %s522_s24, %s523_s25  }
  0x14   :  { %s448_s30 = scalar_lea.hbm %s603_s0, 1024 }
  0x15   :  { %p449_p8 = scmp.ne.s32.totalorder %s603_s0, %s448_s30  ;;  %p452_p9 = scmp.lt.u32.totalorder %s448_s30, %s603_s0 }
  0x17   :  { %p454_p10 = pnand %p452_p9, %p449_p8 }
  0x19   :  { %457 = shalt.err (!%p454_p10)
}
  0x1a   :  { %s458_s8 = scalar_lea.vmem %s548_s15, 1024  ;;  %p463_p12 = scmp.lt.s32.totalorder %s548_s15, %s548_s15 }
  0x1b   :  { %p459_p11 = scmp.ne.s32.totalorder %s548_s15, %s458_s8  ;;  %p464_p13 = scmp.lt.s32.totalorder %s458_s8, %s458_s8 }
  0x1d   :  { %p465_p0 = por %p464_p13, %p463_p12 }
  0x1f   :  { %p466_p1 = pnand %p465_p0, %p459_p11 }
  0x21   :  { %469 = shalt.err (!%p466_p1)
}
  0x22   :  { %22 = dma.hbm_to_vmem [thread:$0]  %s603_s0, 1024, %s548_s15, [#allocation3], %s522_s24, %s522_s24, %s523_s25  }
  0x23   :  { %s524_s10 = smov [#allocation7]   ;;  %s470_s14 = scalar_lea.hbm %s605_s2, 16 }
  0x24   :  { %s41_s11 = sshll.u32 %s524_s10, 4  ;;  %p471_p2 = scmp.ne.s32.totalorder %s605_s2, %s470_s14  ;;  %s42_s11 = int_to_ptr.vmem [resolvable:$true] %s41_s11 }
  0x25   :  { %p474_p3 = scmp.lt.u32.totalorder %s470_s14, %s605_s2 }
  0x27   :  { %p476_p4 = pnand %p474_p3, %p471_p2 }
  0x29   :  { %479 = shalt.err (!%p476_p4)
}
  0x2a   :  { %s480_s20 = scalar_lea.vmem %s42_s11, 16  ;;  %s484_s0 = scalar_lea.vmem %s42_s11, 32 }
  0x2b   :  { %p481_p5 = scmp.ne.s32.totalorder %s42_s11, %s480_s20  ;;  %p485_p6 = scmp.lt.s32.totalorder %s42_s11, %s42_s11 }
  0x2c   :  { %p486_p7 = scmp.lt.s32.totalorder %s484_s0, %s480_s20 }
  0x2e   :  { %p487_p8 = por %p486_p7, %p485_p6 }
  0x30   :  { %p488_p9 = pnand %p487_p8, %p481_p5 }
  0x32   :  { %491 = shalt.err (!%p488_p9)
}
  0x33   :  { %44 = dma.hbm_to_vmem [thread:$0]  %s605_s2, 16, %s42_s11, [#allocation6]  }
  0x34   :  { %514 = dma.done.wait [#allocation3], 1024  }
  0x35   :  { %515 = vsyncadd [#allocation3], 4294966272 }
  0x36   :  { %516 = dma.done.wait [#allocation6], 1040  }
  0x37   :  { %517 = vsyncadd [#allocation6], 4294966256  ;;  %v410_v0 = vld [vmem:[#allocation5] sm:$0xff]   ;;  %v411_v1 = vld [vmem:[#allocation5 + $0x8] sm:$0xff]   ;;  %s525_s2 = smov [#allocation8]  }
  0x38   :  { %354 = vmatprep.subr.bf16.mxu0 %v410_v0  ;;  %386 = vmatprep.subr.bf16.mxu1 %v410_v0  ;;  %v412_v2 = vld [vmem:[#allocation5 + $0x10] sm:$0xff]   ;;  %v413_v3 = vld [vmem:[#allocation5 + $0x18] sm:$0xff]   ;;  %v418_v4 = vld [vmem:[#allocation2] sm:$0xff]   ;;  %s308_s22 = sshll.u32 %s525_s2, 4  ;;  %s309_s22 = int_to_ptr.vmem [resolvable:$true] %s308_s22 }
  0x39   :  { %355 = vmatpush3.bf16.msra.mxu0 %v410_v0  ;;  %394 = vmatpush3.bf16.msra.mxu1 %v410_v0  ;;  %v419_v5 = vld [vmem:[#allocation2 + $0x20] sm:$0xff]   ;;  %v415_v7 = vld [vmem:[#allocation5 + $0x28] sm:$0xff]   ;;  %v416_v8 = vld [vmem:[#allocation5 + $0x30] sm:$0xff]   ;;  %s492_s23 = scalar_lea.vmem %s309_s22, 2048  ;;  %p497_p11 = scmp.lt.s32.totalorder %s309_s22, %s309_s22 }
  0x3a   :  { %356 = vmatprep.subr.bf16.mxu0 %v411_v1  ;;  %387 = vmatprep.subr.bf16.mxu1 %v411_v1  ;;  %v414_v6 = vld [vmem:[#allocation5 + $0x20] sm:$0xff]   ;;  %v417_v9 = vld [vmem:[#allocation5 + $0x38] sm:$0xff]   ;;  %v420_v10 = vld [vmem:[#allocation2 + $0x8] sm:$0xff]   ;;  %p493_p10 = scmp.ne.s32.totalorder %s309_s22, %s492_s23  ;;  %p498_p12 = scmp.lt.s32.totalorder %s492_s23, %s492_s23 }
  0x3b   :  { %370 = vmatprep.mubr.bf16.mxu0 %v418_v4  ;;  %378 = vmatprep.mubr.bf16.mxu1 %v419_v5  ;;  %v421_v11 = vld [vmem:[#allocation2 + $0x28] sm:$0xff]   ;;  %v422_v12 = vld [vmem:[#allocation2 + $0x10] sm:$0xff]   ;;  %v424_v14 = vld [vmem:[#allocation2 + $0x18] sm:$0xff]  }
  0x3c   :  { %v423_v13 = vld [vmem:[#allocation2 + $0x30] sm:$0xff]   ;;  %v425_v15 = vld [vmem:[#allocation2 + $0x38] sm:$0xff]   ;;  %v321_v16 = vld [vmem:[#allocation7] ss:$0 sm:$0xff]  ;;  %p499_p13 = por %p498_p12, %p497_p11 }
  0x3d   :  { %357 = vmatpush3.bf16.msra.mxu0 %v411_v1  ;;  %395 = vmatpush3.bf16.msra.mxu1 %v411_v1 }
  0x3e   :  { %358 = vmatprep.subr.bf16.mxu0 %v412_v2  ;;  %388 = vmatprep.subr.bf16.mxu1 %v412_v2  ;;  %p500_p0 = pnand %p499_p13, %p493_p10 }
  0x41   :  { %359 = vmatpush3.bf16.msra.mxu0 %v412_v2  ;;  %396 = vmatpush3.bf16.msra.mxu1 %v412_v2 }
  0x42   :  { %360 = vmatprep.subr.bf16.mxu0 %v413_v3  ;;  %389 = vmatprep.subr.bf16.mxu1 %v413_v3 }
  0x45   :  { %361 = vmatpush3.bf16.msra.mxu0 %v413_v3  ;;  %397 = vmatpush3.bf16.msra.mxu1 %v413_v3 }
  0x46   :  { %362 = vmatprep.subr.bf16.mxu0 %v414_v6  ;;  %390 = vmatprep.subr.bf16.mxu1 %v414_v6 }
  0x49   :  { %363 = vmatpush3.bf16.msra.mxu0 %v414_v6  ;;  %398 = vmatpush3.bf16.msra.mxu1 %v414_v6 }
  0x4a   :  { %364 = vmatprep.subr.bf16.mxu0 %v415_v7  ;;  %391 = vmatprep.subr.bf16.mxu1 %v415_v7 }
  0x4d   :  { %365 = vmatpush3.bf16.msra.mxu0 %v415_v7  ;;  %399 = vmatpush3.bf16.msra.mxu1 %v415_v7 }
  0x4e   :  { %366 = vmatprep.subr.bf16.mxu0 %v416_v8  ;;  %392 = vmatprep.subr.bf16.mxu1 %v416_v8 }
  0x51   :  { %367 = vmatpush3.bf16.msra.mxu0 %v416_v8  ;;  %400 = vmatpush3.bf16.msra.mxu1 %v416_v8 }
  0x52   :  { %368 = vmatprep.subr.bf16.mxu0 %v417_v9  ;;  %393 = vmatprep.subr.bf16.mxu1 %v417_v9 }
  0x55   :  { %369 = vmatpush3.bf16.msra.mxu0 %v417_v9  ;;  %401 = vmatpush3.bf16.msra.mxu1 %v417_v9 }
  0x58   :  { %371 = vmatmul.mubr.bf16.vlgmr.msra.gmra.mrb[0].mxu0 %v420_v10  ;;  %379 = vmatmul.mubr.bf16.vlgmr.msra.gmra.mrb[0].mxu1 %v421_v11 }
  0x59   :  { %374 = vmatprep.mubr.bf16.mxu0 %v422_v12  ;;  %382 = vmatprep.mubr.bf16.mxu1 %v423_v13 }
  0x60   :  { %375 = vmatmul.mubr.bf16.gmra.mrb[4].mxu0 %v424_v14  ;;  %383 = vmatmul.mubr.bf16.gmra.mrb[4].mxu1 %v425_v15 }
 0x12b   :  { %v372_v17 = vpop.f32.mrb[0].mxu0  ;;  %v380_v18 = vpop.f32.mrb[0].mxu1 }
 0x12c   :  { %v233_v19 = vadd.f32 %v372_v17, %v321_v16  ;;  %v265_v20 = vadd.f32 %v380_v18, %v321_v16  ;;  %v224_v21 = vpop.f32.mrb[1].mxu0  ;;  %v256_v22 = vpop.f32.mrb[1].mxu1 }
 0x12d   :  { %v225_v23 = vadd.f32 %v321_v16, %v224_v21  ;;  %v257_v24 = vadd.f32 %v321_v16, %v256_v22  ;;  %v373_v25 = vpop.f32.mrb[2].mxu0  ;;  %v381_v26 = vpop.f32.mrb[2].mxu1 }
 0x12e   :  { %289 = vst [vmem:[#allocation8 + $0x10] sm:$0xff] %v233_v19  ;;  %297 = vst [vmem:[#allocation8 + $0x50] sm:$0xff] %v265_v20  ;;  %v236_v27 = vadd.f32 %v373_v25, %v321_v16  ;;  %v268_v28 = vadd.f32 %v381_v26, %v321_v16  ;;  %v227_v29 = vpop.f32.mrb[3].mxu0  ;;  %v259_v30 = vpop.f32.mrb[3].mxu1 }
 0x12f   :  { %287 = vst [vmem:[#allocation8] sm:$0xff] %v225_v23  ;;  %295 = vst [vmem:[#allocation8 + $0x40] sm:$0xff] %v257_v24  ;;  %v228_v31 = vadd.f32 %v321_v16, %v227_v29  ;;  %v260_v32 = vadd.f32 %v321_v16, %v259_v30 }
 0x130   :  { %290 = vst [vmem:[#allocation8 + $0x18] sm:$0xff] %v236_v27  ;;  %298 = vst [vmem:[#allocation8 + $0x58] sm:$0xff] %v268_v28 }
 0x131   :  { %288 = vst [vmem:[#allocation8 + $0x8] sm:$0xff] %v228_v31  ;;  %296 = vst [vmem:[#allocation8 + $0x48] sm:$0xff] %v260_v32 }
 0x133   :  { %v376_v33 = vpop.f32.mrb[4].mxu0  ;;  %v384_v34 = vpop.f32.mrb[4].mxu1 }
 0x134   :  { %v249_v35 = vadd.f32 %v376_v33, %v321_v16  ;;  %v281_v36 = vadd.f32 %v384_v34, %v321_v16  ;;  %v240_v37 = vpop.f32.mrb[5].mxu0  ;;  %v272_v38 = vpop.f32.mrb[5].mxu1 }
 0x135   :  { %v241_v39 = vadd.f32 %v321_v16, %v240_v37  ;;  %v273_v40 = vadd.f32 %v321_v16, %v272_v38  ;;  %v377_v41 = vpop.f32.mrb[6].mxu0  ;;  %v385_v42 = vpop.f32.mrb[6].mxu1 }
 0x136   :  { %293 = vst [vmem:[#allocation8 + $0x30] sm:$0xff] %v249_v35  ;;  %301 = vst [vmem:[#allocation8 + $0x70] sm:$0xff] %v281_v36  ;;  %v252_v43 = vadd.f32 %v377_v41, %v321_v16  ;;  %v284_v44 = vadd.f32 %v385_v42, %v321_v16  ;;  %v243_v45 = vpop.f32.mrb[7].mxu0  ;;  %v275_v46 = vpop.f32.mrb[7].mxu1 }
 0x137   :  { %291 = vst [vmem:[#allocation8 + $0x20] sm:$0xff] %v241_v39  ;;  %299 = vst [vmem:[#allocation8 + $0x60] sm:$0xff] %v273_v40  ;;  %v244_v47 = vadd.f32 %v321_v16, %v243_v45  ;;  %v276_v48 = vadd.f32 %v321_v16, %v275_v46 }
 0x138   :  { %294 = vst [vmem:[#allocation8 + $0x38] sm:$0xff] %v252_v43  ;;  %302 = vst [vmem:[#allocation8 + $0x78] sm:$0xff] %v284_v44 }
 0x139   :  { %292 = vst [vmem:[#allocation8 + $0x28] sm:$0xff] %v244_v47  ;;  %300 = vst [vmem:[#allocation8 + $0x68] sm:$0xff] %v276_v48 }
 0x13a   :  { %503 = shalt.err (!%p500_p0)
}
 0x13b   :  { %s504_s26 = scalar_lea.hbm %s606_s3, 2048 }
 0x13c   :  { %p505_p1 = scmp.ne.s32.totalorder %s606_s3, %s504_s26  ;;  %p508_p2 = scmp.lt.u32.totalorder %s504_s26, %s606_s3 }
 0x13e   :  { %p510_p3 = pnand %p508_p2, %p505_p1 }
 0x140   :  { %513 = shalt.err (!%p510_p3)
}
 0x141   :  { %s526_s4 = smov 128   ;;  %s527_s5 = smov 8  }
 0x142   :  { %314 = dma.vmem_to_hbm [thread:$0]  %s309_s22, 2048, %s606_s3, [#allocation4], %s526_s4, %s526_s4, %s527_s5  }
 0x143   :  { %518 = dma.done.wait [#allocation4], 2048  }
 0x144   :  { %519 = vsyncadd [#allocation4], 4294965248 }
 0x145   :  { %318 = vsyncpa [#allocation3], 1 }
 0x146   :  { %319 = vsyncpa [#allocation6], 1 }
 0x147   :  { %320 = vsyncpa [#allocation4], 1 }

</bundles_post_ra>
